<compile_context>
chip_gen: v5e
topology: v5e:2x2
jax: 0.10.0
libtpu: 0.0.40
codegen_flags: <defaults>
</compile_context>

<pallas_src>
import jax
import jax.numpy as jnp
from jax import lax
from jax.experimental import pallas as pl
from jax.experimental.pallas import tpu as pltpu


def _round_up(x, m):
    return ((x + m - 1) // m) * m


def generator_kernel(x_ref, w_ref, b_ref, o_ref, m_ref, l_ref):
    # x_ref: (tm, Dp) bf16, w_ref: (tv, Dp) bf16, b_ref: (1, tv) f32,
    # o_ref: (tm, tv), m_ref / l_ref: (tm, 1) f32 resident scratch.
    p = pl.program_id(1)   # pass: 0 = online logsumexp stats, 1 = write output
    v = pl.program_id(2)   # vocab tile

    # MXU matmul, RHS contracted on dim 1 (no W^T in HBM), f32 accumulation.
    # NOTE: verify in the bundle dump that Mosaic does not emit a per-tile
    # vxpose for the transposed-RHS contraction; if it does, materialize W^T
    # once in the wrapper instead.
    logits = lax.dot_general(
        x_ref[...],
        w_ref[...],
        dimension_numbers=(((1,), (1,)), ((), ())),
        preferred_element_type=jnp.float32,
    ) + b_ref[...]

    @pl.when(p == 0)
    def _():
        @pl.when(v == 0)
        def _():
            m_ref[...] = jnp.full_like(m_ref, -jnp.inf)
            l_ref[...] = jnp.zeros_like(l_ref)

        m_prev = m_ref[...]
        m_new = jnp.maximum(m_prev, jnp.max(logits, axis=-1, keepdims=True))
        l_ref[...] = l_ref[...] * jnp.exp(m_prev - m_new) + jnp.sum(
            jnp.exp(logits - m_new), axis=-1, keepdims=True
        )
        m_ref[...] = m_new
        # No o_ref write on the stats pass: the output block index is pinned
        # at (i, 0) for p == 0, so nothing is flushed to HBM here.

    @pl.when(p == 1)
    def _():
        lse = m_ref[...] + jnp.log(l_ref[...])
        o_ref[...] = (logits - lse).astype(o_ref.dtype)


def _vmem_capacity_bytes():
    try:
        return int(pltpu.get_tpu_info().vmem_capacity_bytes)
    except Exception:
        return 64 * 1024 * 1024   # conservative: valid on every TPU generation


def _vmem_need(tm, tv, dp):
    return (
        2 * tm * dp * 2        # x tiles (bf16, double-buffered)
        + 2 * tv * dp * 2      # weight tiles (bf16, double-buffered)
        + 2 * tv * 4           # bias tiles (f32)
        + 2 * tm * tv * 4      # output tiles (f32, double-buffered)
        + 2 * tm * 128 * 4     # (tm, 1) scratch, lane-padded, x2
        + 3 * tm * tv * 4      # compiler temporaries: f32 logits, exp, sub
        + (2 << 20)            # slack
    )


def _pick_tiles(M, V, dp, vmem_cap):
    """Prefer the largest row tile (amortizes the weight stream), then the
    largest vocab tile, subject to the generation-aware VMEM cap."""
    tv_full = _round_up(V, 128)
    best = None
    for tm_cand in (1024, 512, 256, 128, 64, 32, 16, 8):
        tm_eff = min(tm_cand, _round_up(M, 8))
        for tv_cand in (2048, 1024, 512, 256, 128):
            tv_eff = min(tv_cand, tv_full)
            if _vmem_need(tm_eff, tv_eff, dp) <= vmem_cap:
                best = (tm_eff, tv_eff)
                break
        if best is not None:
            break
    if best is None:
        best = (8, 128)
    tm, tv = best
    # Megacore guard: keep >= 2 row tiles when there are enough rows so the
    # 'parallel' row axis can be sharded across v7x's two TensorCores.
    if M >= 512 and _round_up(M, tm) // tm < 2:
        tm = _round_up((M + 1) // 2, 8)
    return tm, tv


def generator_forward(x, weight, bias, *, tm=None, tv=None,
                      out_dtype=jnp.float32):
    """x: (B, S, D); weight: (V, D) (f32 or pre-cast bf16); bias: (V,).
    Returns (B, S, V) log-probs."""
    B, S, D = x.shape
    V = weight.shape[0]
    M = B * S

    # Pad the contraction dim to the MXU-native width (256 on v6e/v7x).
    Dp = _round_up(D, 256)

    # Generation-aware VMEM budget: ~75% of physical capacity
    # (~48 MiB on v7x, ~96 MiB on v5e/v6e) leaves headroom for Mosaic scratch.
    vmem_cap = (_vmem_capacity_bytes() * 3) // 4

    auto_tm, auto_tv = _pick_tiles(M, V, Dp, vmem_cap)
    tm = auto_tm if tm is None else tm
    tv = auto_tv if tv is None else tv

    Mp = _round_up(M, tm)
    Vp = _round_up(V, tv)

    # bf16 MXU operands.  The weight cast is hoisted: pass a pre-cast bf16
    # weight (done once at parameter load) and this is a no-op.
    x2 = x.reshape(M, D)
    if x2.dtype != jnp.bfloat16:
        x2 = x2.astype(jnp.bfloat16)
    w = weight if weight.dtype == jnp.bfloat16 else weight.astype(jnp.bfloat16)
    b2 = bias.astype(jnp.float32).reshape(1, V)

    if Mp != M or Dp != D:
        x2 = jnp.pad(x2, ((0, Mp - M), (0, Dp - D)))
    if Vp != V or Dp != D:
        w = jnp.pad(w, ((0, Vp - V), (0, Dp - D)))
    if Vp != V:
        # Padded vocab columns get a huge negative bias so they never affect
        # the logsumexp; their outputs are sliced off below.  (Vp - V < tv is
        # guaranteed, so every vocab tile contains at least one real column.)
        b2 = jnp.pad(b2, ((0, 0), (0, Vp - V)), constant_values=-1e30)

    grid = (Mp // tm, 2, Vp // tv)

    vmem_limit = int(min(vmem_cap,
                         max(_vmem_need(tm, tv, Dp), 32 * 1024 * 1024)))

    out = pl.pallas_call(
        generator_kernel,
        out_shape=jax.ShapeDtypeStruct((Mp, Vp), out_dtype),
        grid_spec=pltpu.PrefetchScalarGridSpec(
            num_scalar_prefetch=0,
            grid=grid,
            in_specs=[
                pl.BlockSpec((tm, Dp), lambda i, p, v: (i, 0)),
                pl.BlockSpec((tv, Dp), lambda i, p, v: (v, 0)),
                pl.BlockSpec((1, tv), lambda i, p, v: (0, v)),
            ],
            # Output block stays pinned at (i, 0) during pass 0 (no HBM
            # writeback); it advances and flushes only during pass 1, where
            # every visited block is fully overwritten.
            out_specs=pl.BlockSpec((tm, tv), lambda i, p, v: (i, v * p)),
            scratch_shapes=[
                pltpu.VMEM((tm, 1), jnp.float32),   # running max
                pltpu.VMEM((tm, 1), jnp.float32),   # running sum
            ],
        ),
        compiler_params=pltpu.CompilerParams(
            dimension_semantics=("parallel", "arbitrary", "arbitrary"),
            vmem_limit_bytes=vmem_limit,
        ),
    )(x2, w, b2)

    return out[:M, :V].reshape(B, S, V)


def _reference(x, weight, bias):
    # Reference with the same bf16-rounded matmul operands (f32 math) so the
    # tolerance can stay tight.
    xb = x.astype(jnp.bfloat16).astype(jnp.float32)
    wb = weight.astype(jnp.float32).astype(jnp.bfloat16).astype(jnp.float32)
    logits = jnp.einsum("bsd,vd->bsv", xb, wb,
                        precision=lax.Precision.HIGHEST) + bias
    return jax.nn.log_softmax(logits, axis=-1)


if __name__ == "__main__":
    key = jax.random.PRNGKey(0)

    # Case 1: small shapes consistent with the module: (B, Sc, Dc) -> (B, Sc, V)
    B, S, D, V = 2, 8, 32, 128
    kx, kw, kb = jax.random.split(key, 3)
    x = jax.random.normal(kx, (B, S, D), dtype=jnp.float32)
    bound = 1.0 / jnp.sqrt(jnp.float32(D))
    weight = jax.random.uniform(kw, (V, D), minval=-bound, maxval=bound,
                                dtype=jnp.float32)
    bias = jax.random.uniform(kb, (V,), minval=-bound, maxval=bound,
                              dtype=jnp.float32)

    # Hoisted weight cast: do the bf16 cast once "at parameter load".
    weight_bf16 = weight.astype(jnp.bfloat16)

    out = jax.block_until_ready(generator_forward(x, weight_bf16, bias))
    ref = _reference(x, weight, bias)
    assert out.shape == (B, S, V)
    assert jnp.allclose(out, ref, atol=1e-3, rtol=1e-3), float(
        jnp.max(jnp.abs(out - ref)))

    # Case 2: ragged rows + multiple vocab tiles (exercises padding, the online
    # logsumexp across V tiles, and the pinned-output two-pass finalize).
    B2, S2, D2, V2 = 2, 5, 32, 384
    kx2, kw2, kb2 = jax.random.split(jax.random.PRNGKey(1), 3)
    x_r = jax.random.normal(kx2, (B2, S2, D2), dtype=jnp.float32)
    bound2 = 1.0 / jnp.sqrt(jnp.float32(D2))
    w_r = jax.random.uniform(kw2, (V2, D2), minval=-bound2, maxval=bound2,
                             dtype=jnp.float32)
    b_r = jax.random.uniform(kb2, (V2,), minval=-bound2, maxval=bound2,
                             dtype=jnp.float32)

    out_r = jax.block_until_ready(generator_forward(x_r, w_r, b_r, tv=128))
    ref_r = _reference(x_r, w_r, b_r)
    assert out_r.shape == (B2, S2, V2)
    assert jnp.allclose(out_r, ref_r, atol=1e-3, rtol=1e-3), float(
        jnp.max(jnp.abs(out_r - ref_r)))

    print("KERNEL_OK")
</pallas_src>

<mosaic_0001>
module attributes {stable_mosaic.version = 11 : i64} {
  func.func @generator_kernel(%arg0: i32, %arg1: i32, %arg2: i32, %arg3: memref<16x256xbf16, #tpu.memory_space<vmem>>, %arg4: memref<128x256xbf16, #tpu.memory_space<vmem>>, %arg5: memref<1x128xf32, #tpu.memory_space<vmem>>, %arg6: memref<16x128xf32, #tpu.memory_space<vmem>>, %arg7: memref<16x1xf32, #tpu.memory_space<vmem>>, %arg8: memref<16x1xf32, #tpu.memory_space<vmem>>) attributes {dimension_semantics = [#tpu.dimension_semantics<parallel>, #tpu.dimension_semantics<arbitrary>, #tpu.dimension_semantics<arbitrary>], iteration_bounds = array<i64: 1, 2, 1>, scalar_prefetch = 0 : i64, scratch_operands = 2 : i64, tpu.core_type = #tpu.core_type<tc>, window_params = [{transform_indices = @transform_0, window_bounds = array<i64: 16, 256>}, {transform_indices = @transform_1, window_bounds = array<i64: 128, 256>}, {transform_indices = @transform_2, window_bounds = array<i64: 1, 128>}, {transform_indices = @transform_3, window_bounds = array<i64: 16, 128>}]} {
    %c0 = arith.constant 0 : index
    %c0_0 = arith.constant 0 : index
    %0 = vector.load %arg3[%c0, %c0_0] : memref<16x256xbf16, #tpu.memory_space<vmem>>, vector<16x256xbf16>
    %c0_1 = arith.constant 0 : index
    %c0_2 = arith.constant 0 : index
    %1 = vector.load %arg4[%c0_1, %c0_2] : memref<128x256xbf16, #tpu.memory_space<vmem>>, vector<128x256xbf16>
    %cst = arith.constant dense<0.000000e+00> : vector<16x128xf32>
    %2 = tpu.matmul %0, %1, %cst {dimension_numbers = #tpu.dot_dimension_numbers<[1], [1], [0], [0], [0, 0, 1, 0], [], []>} : vector<16x256xbf16>, vector<128x256xbf16>, vector<16x128xf32> -> vector<16x128xf32>
    %c0_3 = arith.constant 0 : index
    %c0_4 = arith.constant 0 : index
    %3 = vector.load %arg5[%c0_3, %c0_4] : memref<1x128xf32, #tpu.memory_space<vmem>>, vector<1x128xf32>
    %4 = vector.broadcast %3 : vector<1x128xf32> to vector<16x128xf32>
    %5 = arith.addf %2, %4 : vector<16x128xf32>
    %c0_i32 = arith.constant 0 : i32
    %6 = arith.cmpi eq, %arg1, %c0_i32 : i32
    %7 = arith.extui %6 : i1 to i32
    %c0_i32_5 = arith.constant 0 : i32
    %8 = arith.cmpi ne, %7, %c0_i32_5 : i32
    scf.if %8 {
      %c0_i32_7 = arith.constant 0 : i32
      %12 = arith.cmpi eq, %arg2, %c0_i32_7 : i32
      %13 = arith.extui %12 : i1 to i32
      %c0_i32_8 = arith.constant 0 : i32
      %14 = arith.cmpi ne, %13, %c0_i32_8 : i32
      scf.if %14 {
        %cst_19 = arith.constant 0xFF800000 : f32
        %31 = vector.broadcast %cst_19 : f32 to vector<16x1xf32>
        %c0_20 = arith.constant 0 : index
        %c0_21 = arith.constant 0 : index
        %32 = vector.load %arg7[%c0_20, %c0_21] : memref<16x1xf32, #tpu.memory_space<vmem>>, vector<16x1xf32>
        tpu.vector_store %arg7[%c0_20, %c0_21], %31 {strides = array<i32>} : memref<16x1xf32, #tpu.memory_space<vmem>>, vector<16x1xf32>,
        %cst_22 = arith.constant 0.000000e+00 : f32
        %33 = vector.broadcast %cst_22 : f32 to vector<16x1xf32>
        %c0_23 = arith.constant 0 : index
        %c0_24 = arith.constant 0 : index
        %34 = vector.load %arg8[%c0_23, %c0_24] : memref<16x1xf32, #tpu.memory_space<vmem>>, vector<16x1xf32>
        tpu.vector_store %arg8[%c0_23, %c0_24], %33 {strides = array<i32>} : memref<16x1xf32, #tpu.memory_space<vmem>>, vector<16x1xf32>,
      } else {
      }
      %c0_9 = arith.constant 0 : index
      %c0_10 = arith.constant 0 : index
      %15 = vector.load %arg7[%c0_9, %c0_10] : memref<16x1xf32, #tpu.memory_space<vmem>>, vector<16x1xf32>
      %cst_11 = arith.constant dense<0xFF800000> : vector<16xf32>
      %16 = vector.multi_reduction <maximumf>, %5, %cst_11 [1] : vector<16x128xf32> to vector<16xf32>
      %17 = vector.shape_cast %16 : vector<16xf32> to vector<16x1xf32>
      %18 = arith.maximumf %15, %17 : vector<16x1xf32>
      %c0_12 = arith.constant 0 : index
      %c0_13 = arith.constant 0 : index
      %19 = vector.load %arg8[%c0_12, %c0_13] : memref<16x1xf32, #tpu.memory_space<vmem>>, vector<16x1xf32>
      %20 = arith.subf %15, %18 : vector<16x1xf32>
      %21 = math.exp %20 : vector<16x1xf32>
      %22 = arith.mulf %19, %21 : vector<16x1xf32>
      %23 = vector.broadcast %18 : vector<16x1xf32> to vector<16x128xf32>
      %24 = arith.subf %5, %23 : vector<16x128xf32>
      %25 = math.exp %24 : vector<16x128xf32>
      %cst_14 = arith.constant dense<0.000000e+00> : vector<16xf32>
      %26 = vector.multi_reduction <add>, %25, %cst_14 [1] : vector<16x128xf32> to vector<16xf32>
      %27 = vector.shape_cast %26 : vector<16xf32> to vector<16x1xf32>
      %28 = arith.addf %22, %27 : vector<16x1xf32>
      %c0_15 = arith.constant 0 : index
      %c0_16 = arith.constant 0 : index
      %29 = vector.load %arg8[%c0_15, %c0_16] : memref<16x1xf32, #tpu.memory_space<vmem>>, vector<16x1xf32>
      tpu.vector_store %arg8[%c0_15, %c0_16], %28 {strides = array<i32>} : memref<16x1xf32, #tpu.memory_space<vmem>>, vector<16x1xf32>,
      %c0_17 = arith.constant 0 : index
      %c0_18 = arith.constant 0 : index
      %30 = vector.load %arg7[%c0_17, %c0_18] : memref<16x1xf32, #tpu.memory_space<vmem>>, vector<16x1xf32>
      tpu.vector_store %arg7[%c0_17, %c0_18], %18 {strides = array<i32>} : memref<16x1xf32, #tpu.memory_space<vmem>>, vector<16x1xf32>,
    } else {
    }
    %c1_i32 = arith.constant 1 : i32
    %9 = arith.cmpi eq, %arg1, %c1_i32 : i32
    %10 = arith.extui %9 : i1 to i32
    %c0_i32_6 = arith.constant 0 : i32
    %11 = arith.cmpi ne, %10, %c0_i32_6 : i32
    scf.if %11 {
      %c0_7 = arith.constant 0 : index
      %c0_8 = arith.constant 0 : index
      %12 = vector.load %arg7[%c0_7, %c0_8] : memref<16x1xf32, #tpu.memory_space<vmem>>, vector<16x1xf32>
      %c0_9 = arith.constant 0 : index
      %c0_10 = arith.constant 0 : index
      %13 = vector.load %arg8[%c0_9, %c0_10] : memref<16x1xf32, #tpu.memory_space<vmem>>, vector<16x1xf32>
      %14 = math.log %13 : vector<16x1xf32>
      %15 = arith.addf %12, %14 : vector<16x1xf32>
      %16 = vector.broadcast %15 : vector<16x1xf32> to vector<16x128xf32>
      %17 = arith.subf %5, %16 : vector<16x128xf32>
      %c0_11 = arith.constant 0 : index
      %c0_12 = arith.constant 0 : index
      %18 = vector.load %arg6[%c0_11, %c0_12] : memref<16x128xf32, #tpu.memory_space<vmem>>, vector<16x128xf32>
      tpu.vector_store %arg6[%c0_11, %c0_12], %17 {strides = array<i32>} : memref<16x128xf32, #tpu.memory_space<vmem>>, vector<16x128xf32>,
    } else {
    }
    return
  }
  func.func @transform_0(%arg0: i32, %arg1: i32, %arg2: i32) -> (i32, i32) {
    %c0_i32 = arith.constant 0 : i32
    %c0_i32_0 = arith.constant 0 : i32
    return %arg0, %c0_i32 : i32, i32
  }
  func.func @transform_1(%arg0: i32, %arg1: i32, %arg2: i32) -> (i32, i32) {
    %c0_i32 = arith.constant 0 : i32
    %c0_i32_0 = arith.constant 0 : i32
    return %arg2, %c0_i32 : i32, i32
  }
  func.func @transform_2(%arg0: i32, %arg1: i32, %arg2: i32) -> (i32, i32) {
    %c0_i32 = arith.constant 0 : i32
    %c0_i32_0 = arith.constant 0 : i32
    return %c0_i32, %arg2 : i32, i32
  }
  func.func @transform_3(%arg0: i32, %arg1: i32, %arg2: i32) -> (i32, i32) {
    %0 = arith.muli %arg2, %arg1 : i32
    %c0_i32 = arith.constant 0 : i32
    return %arg0, %0 : i32, i32
  }
}

</mosaic_0001>

<bundles_post_ra>
// kernel: tpu_custom_call.1
= control target key start
LH: loop header
LB: loop body
LE: loop exit
PB: predicated region body
PF: predicated region fallthrough
CT: control target
= control target key end

     0   :  { %8 = vsyncpa [#allocation5], 0  ;;  %s1020_s0 = inlined_call_operand.hbm [shape: bf16[16,256], index: 0, kind: input, shape index: {}]   ;;  %s1021_s1 = inlined_call_operand.hbm [shape: bf16[128,256], index: 1, kind: input, shape index: {}]   ;;  %s1022_s2 = inlined_call_operand.vmem [shape: f32[1,128], index: 2, kind: input, shape index: {}]   ;;  %s1023_s3 = inlined_call_operand.hbm [shape: f32[16,128], index: 3, kind: output, shape index: {}]  }
   0x1   :  { %9 = vsyncpa [#allocation8], 0 }
   0x2   :  { %10 = vsyncpa [#allocation6], 0 }
   0x3   :  { %12 = vsyncpa [#allocation6 + $0x1], 0  ;;  %s928_s12 = smov 0   ;;  %s930_s13 = smov 0  }
   0x4   :  { %s932_s14 = smov 0  }
   0x5 LB: > { %s587_s15 = sadd.s32 4294967295, %s895_s14   ;;  %s588_s16 = sadd.s32 4294967294, %s895_s14   ;;  %s895_s14 = sphi %s932_s14, %s18_s14   ;;  %s891_s13 = sphi %s930_s13, %s1027_s13   ;;  %s887_s12 = sphi %s928_s12, %s1026_s12  }
   0x6   : > { %s33_s17 = sadd.s32 1, %s891_s13  ;;  %p589_p0 = scmp.ge.s32.totalorder %s895_s14, 1 }
   0x7   : > { %p35_p1 = scmp.ge.s32.totalorder %s33_s17, 2  ;;  %p150_p2 = scmp.lt.s32.totalorder %s895_s14, 3 }
   0x8   : > { %p950_p3 = scmp.eq.s32.totalorder %s587_s15, 0  ;;  %s165_s22 = sshll.u32 %s1020_s0, 4  ;;  %s166_s22 = int_to_ptr.hbm [resolvable:$true] %s165_s22 }
   0x9   : > { %s1029_s17 = smov (%p35_p1, %s33_s17), 0  ;;  %p956_p4 = pnand %p589_p0, %p150_p2 }
   0xa   : > { %s897_s23 = smov [#allocation4]   ;;  %s183_s27 = sshll.u32 %s1021_s1, 4  ;;  %s184_s27 = int_to_ptr.hbm [resolvable:$true] %s183_s27 }
   0xb   : > { %p704_p5 = pneg %p956_p4  ;;  %s167_s24 = sshll.u32 %s897_s23, 4  ;;  %s168_s24 = int_to_ptr.vmem [resolvable:$true] %s167_s24 }
   0xc   : > { %s898_s28 = smov 128   ;;  %s899_s29 = smov 8  }
   0xd   : > { %p705_p6 = pnand %p950_p3, %p704_p5  ;;  %s900_s30 = smov [#allocation7]  }
   0xe   : > { %s185_s4 = sshll.u32 %s900_s30, 4  ;;  %207 = sbr.rel (%p956_p4) target bundleno = 745 (0x2e9), region = 32  ;;  %s186_s4 = int_to_ptr.vmem [resolvable:$true] %s185_s4 }
   0xf   : > { %707 = dma.hbm_to_vmem [thread:$0]  (!%p705_p6), %s166_s22, 256, %s168_s24, [#allocation5], %s898_s28, %s898_s28, %s899_s29  }
  0x10   : > { %710 = dma.hbm_to_vmem [thread:$0]  (!%p705_p6), %s184_s27, 2048, %s186_s4, [#allocation8], %s898_s28, %s898_s28, %s899_s29  }
  0x13   : > { %874 = dma.done.wait (%p950_p3), [#allocation5], 256  }
  0x14   : > { %876 = vsyncadd (%p950_p3), [#allocation5], 4294967040 }
  0x15   : > { %878 = dma.done.wait (%p950_p3), [#allocation8], 2048  }
  0x16   : > { %880 = vsyncadd (%p950_p3), [#allocation8], 4294965248  ;;  %v662_v0 = vld [vmem:[#allocation7 + $0x70] sm:$0xf]  ;;  %v691_v1 = vld [vmem:[#allocation7 + $0x74] sm:$0xf0] }
  0x17   : > { %v690_v2 = vld [vmem:[#allocation7 + $0x74] sm:$0xf]  ;;  %v663_v3 = vor.u32 %v691_v1, %v662_v0  ;;  %v664_v4 = vld [vmem:[#allocation7 + $0x78] sm:$0xf0]  ;;  %v654_v6 = vld [vmem:[#allocation7 + $0x60] sm:$0xf] }
  0x18   : > { %v667_v5 = vor.u32 %v690_v2, %v664_v4  ;;  %v689_v7 = vld [vmem:[#allocation7 + $0x64] sm:$0xf0]  ;;  %v688_v8 = vld [vmem:[#allocation7 + $0x64] sm:$0xf]  ;;  %v656_v9 = vld [vmem:[#allocation7 + $0x68] sm:$0xf0] }
  0x19   : > { %354 = vmatpush.bf16.xpose.msra.mxu0 %v663_v3  ;;  %v655_v10 = vor.u32 %v689_v7, %v654_v6  ;;  %v659_v11 = vor.u32 %v688_v8, %v656_v9  ;;  %v646_v12 = vld [vmem:[#allocation7 + $0x50] sm:$0xf]  ;;  %v687_v13 = vld [vmem:[#allocation7 + $0x54] sm:$0xf0]  ;;  %v686_v14 = vld [vmem:[#allocation7 + $0x54] sm:$0xf] }
  0x1a   : > { %368 = vmatpush.bf16.xpose.msra.mxu1 %v667_v5  ;;  %v648_v15 = vld [vmem:[#allocation7 + $0x58] sm:$0xf0]  ;;  %v647_v16 = vor.u32 %v687_v13, %v646_v12  ;;  %v638_v18 = vld [vmem:[#allocation7 + $0x40] sm:$0xf]  ;;  %v685_v19 = vld [vmem:[#allocation7 + $0x44] sm:$0xf0] }
  0x1b   : > { %v651_v17 = vor.u32 %v686_v14, %v648_v15  ;;  %v684_v20 = vld [vmem:[#allocation7 + $0x44] sm:$0xf]  ;;  %v640_v21 = vld [vmem:[#allocation7 + $0x48] sm:$0xf0]  ;;  %v639_v22 = vor.u32 %v685_v19, %v638_v18  ;;  %v630_v24 = vld [vmem:[#allocation7 + $0x30] sm:$0xf] }
  0x1c   : > { %v643_v23 = vor.u32 %v684_v20, %v640_v21  ;;  %v683_v25 = vld [vmem:[#allocation7 + $0x34] sm:$0xf0]  ;;  %v682_v26 = vld [vmem:[#allocation7 + $0x34] sm:$0xf]  ;;  %v632_v27 = vld [vmem:[#allocation7 + $0x38] sm:$0xf0] }
  0x1d   : > { %v631_v28 = vor.u32 %v683_v25, %v630_v24  ;;  %v635_v29 = vor.u32 %v682_v26, %v632_v27  ;;  %v622_v30 = vld [vmem:[#allocation7 + $0x20] sm:$0xf]  ;;  %v681_v31 = vld [vmem:[#allocation7 + $0x24] sm:$0xf0]  ;;  %v680_v32 = vld [vmem:[#allocation7 + $0x24] sm:$0xf] }
  0x1e   : > { %v624_v33 = vld [vmem:[#allocation7 + $0x28] sm:$0xf0]  ;;  %v623_v34 = vor.u32 %v681_v31, %v622_v30  ;;  %v614_v36 = vld [vmem:[#allocation7 + $0x10] sm:$0xf]  ;;  %v679_v37 = vld [vmem:[#allocation7 + $0x14] sm:$0xf0] }
  0x1f   : > { %v627_v35 = vor.u32 %v680_v32, %v624_v33  ;;  %v678_v38 = vld [vmem:[#allocation7 + $0x14] sm:$0xf]  ;;  %v616_v39 = vld [vmem:[#allocation7 + $0x18] sm:$0xf0]  ;;  %v615_v40 = vor.u32 %v679_v37, %v614_v36  ;;  %v606_v42 = vld [vmem:[#allocation7] sm:$0xf] }
  0x20   : > { %v619_v41 = vor.u32 %v678_v38, %v616_v39  ;;  %v677_v43 = vld [vmem:[#allocation7 + $0x4] sm:$0xf0]  ;;  %v676_v44 = vld [vmem:[#allocation7 + $0x4] sm:$0xf]  ;;  %v608_v45 = vld [vmem:[#allocation7 + $0x8] sm:$0xf0] }
  0x21   : > { %355 = vmatpush.bf16.xpose.msra.mxu0 %v655_v10  ;;  %v607_v46 = vor.u32 %v677_v43, %v606_v42  ;;  %v611_v47 = vor.u32 %v676_v44, %v608_v45  ;;  %v598_v48 = vld [vmem:[#allocation4] sm:$0xf]  ;;  %v675_v49 = vld [vmem:[#allocation4 + $0x4] sm:$0xf0]  ;;  %v674_v50 = vld [vmem:[#allocation4 + $0x4] sm:$0xf] }
  0x22   : > { %369 = vmatpush.bf16.xpose.msra.mxu1 %v659_v11  ;;  %v600_v51 = vld [vmem:[#allocation4 + $0x8] sm:$0xf0]  ;;  %v599_v52 = vor.u32 %v675_v49, %v598_v48  ;;  %v757_v54 = vld [vmem:[%s1022_s2] ss:$0 sm:$0xff]  ;;  %p668_p7 = scmp.ne.s32.totalorder %s887_s12, 0 }
  0x23   : > { %v603_v53 = vor.u32 %v674_v50, %v600_v51 }
  0x29   : > { %356 = vmatpush.bf16.xpose.msra.mxu0 %v647_v16 }
  0x2a   : > { %370 = vmatpush.bf16.xpose.msra.mxu1 %v651_v17 }
  0x31   : > { %357 = vmatpush.bf16.xpose.msra.mxu0 %v639_v22 }
  0x32   : > { %371 = vmatpush.bf16.xpose.msra.mxu1 %v643_v23 }
  0x39   : > { %358 = vmatpush.bf16.xpose.msra.mxu0 %v631_v28 }
  0x3a   : > { %372 = vmatpush.bf16.xpose.msra.mxu1 %v635_v29 }
  0x41   : > { %359 = vmatpush.bf16.xpose.msra.mxu0 %v623_v34 }
  0x42   : > { %373 = vmatpush.bf16.xpose.msra.mxu1 %v627_v35 }
  0x49   : > { %360 = vmatpush.bf16.xpose.msra.mxu0 %v615_v40 }
  0x4a   : > { %374 = vmatpush.bf16.xpose.msra.mxu1 %v619_v41 }
  0x51   : > { %361 = vmatpush.bf16.xpose.msra.mxu0 %v607_v46 }
  0x52   : > { %375 = vmatpush.bf16.xpose.msra.mxu1 %v611_v47 }
  0x58   : > { %362 = vmatmul.bf16.vlgmr.msra.gmra.mxu0 %v599_v52 }
  0x59   : > { %376 = vmatmul.bf16.vlgmr.msra.gmra.mxu1 %v603_v53 }
  0xd5   : > { %v363_v55 = vpop.f32.mrf.mxu0 }
  0xd6   : > { %v364_v56 = vadd.f32 %v757_v54, %v363_v55  ;;  %v377_v57 = vpop.f32.mrf.mxu1 }
  0xd8   : > { %v983_v58 = vadd.f32 %v377_v57, %v364_v56 }
  0xdc   : > { %385 = sbr.rel (%p668_p7) target bundleno = 596 (0x254), region = 44 }
  0xdd   : > { %v365_v59 = vpop.f32.mrf.mxu0 }
  0xde   : > { %v366_v60 = vadd.f32 %v757_v54, %v365_v59  ;;  %v379_v61 = vpop.f32.mrf.mxu1 }
  0xe0   : > { %v985_v62 = vadd.f32 %v379_v61, %v366_v60 }
  0xe1   : > { %397 = vmax.xlane.f32.xlu0 %v983_v58  ;;  %vm390_vm0 = vcmask 7168   ;;  %v901_v63 = vmov -inf   ;;  %v902_v0 = vmov 0   ;;  %v903_v1 = vmov 0.0  }
  0xe2   : > { %391 = vst.msk [vmem:[#allocation2] sm:$0xff] %vm390_vm0, %v901_v63  ;;  %758 = vset.pattern.permute.xlu1 %v902_v0  ;;  %759 = vset.pattern.permute.xlu0 %v902_v0 }
  0xe3   : > { %392 = vst.msk [vmem:[#allocation2 + $0x8] sm:$0xff] %vm390_vm0, %v901_v63 }
  0xe4   : > { %393 = vst.msk [vmem:[#allocation3] sm:$0xff] %vm390_vm0, %v903_v1 }
  0xe5   : > { %394 = vst.msk [vmem:[#allocation3 + $0x8] sm:$0xff] %vm390_vm0, %v903_v1 }
  0xe9   : > { %399 = vmax.xlane.f32.xlu0 %v985_v62  ;;  %v395_v2 = vld [vmem:[#allocation2] sm:$0xff] }
  0xea   : > { %v396_v6 = vld [vmem:[#allocation2 + $0x8] sm:$0xff] }
  0xeb   : > { %v403_v21 = vld [vmem:[#allocation3] sm:$0xff] }
  0xec   : > { %v404_v26 = vld [vmem:[#allocation3 + $0x8] sm:$0xff] }
 0x154   : > { %v398_v3 = vpop.xlane.xlu0 %397 }
 0x155   : > { %v401_v4 = vmax.f32 %v395_v2, %v398_v3 }
 0x157   : > { %v405_v5 = vsub.f32 %v395_v2, %v401_v4  ;;  %438 = vst.msk [vmem:[#allocation2] sm:$0xff] %vm390_vm0, %v401_v4  ;;  %415 = vperm.xlu1 %758, %v401_v4  }
 0x159   : > { %v407_v18 = vmul.f32 1.442695, %v405_v5 }
 0x15c   : > { %v400_v7 = vpop.xlane.xlu0 %399 }
 0x15d   : > { %v402_v8 = vmax.f32 %v396_v6, %v400_v7 }
 0x15f   : > { %v406_v9 = vsub.f32 %v396_v6, %v402_v8  ;;  %439 = vst.msk [vmem:[#allocation2 + $0x8] sm:$0xff] %vm390_vm0, %v402_v8  ;;  %420 = vperm.xlu1 %758, %v402_v8  }
 0x161   : > { %v409_v19 = vmul.f32 1.442695, %v406_v9 }
 0x1c9   : > { %v416_v10 = vpop.permute.xlu1 %415 }
 0x1ca   : > { %v423_v11 = vsub.f32 %v983_v58, %v416_v10 }
 0x1cc   : > { %v425_v12 = vmul.f32 1.442695, %v423_v11 }
 0x1ce   : > { %760 = vpow2.f32 %v425_v12 }
 0x1d1   : > { %v421_v13 = vpop.permute.xlu1 %420 }
 0x1d2   : > { %v424_v14 = vsub.f32 %v985_v62, %v421_v13 }
 0x1d4   : > { %v761_v15 = vpop.eup %760  ;;  %v427_v16 = vmul.f32 1.442695, %v424_v14 }
 0x1d5   : > { %429 = vadd.xlane.f32.xlu2 %v761_v15 }
 0x1d6   : > { %762 = vpow2.f32 %v427_v16 }
 0x1d7   : > { %764 = vpow2.f32 %v407_v18 }
 0x1d8   : > { %766 = vpow2.f32 %v409_v19 }
 0x1dc   : > { %v763_v17 = vpop.eup %762 }
 0x1dd   : > { %431 = vadd.xlane.f32.xlu2 %v763_v17  ;;  %v765_v20 = vpop.eup %764 }
 0x1de   : > { %v411_v22 = vmul.f32 %v765_v20, %v403_v21  ;;  %v767_v25 = vpop.eup %766 }
 0x1df   : > { %v412_v27 = vmul.f32 %v767_v25, %v404_v26 }
 0x248   : > { %v430_v23 = vpop.xlane.xlu2 %429 }
 0x249   : > { %v433_v24 = vadd.f32 %v430_v23, %v411_v22 }
 0x24b   : > { %436 = vst.msk [vmem:[#allocation3] sm:$0xff] %vm390_vm0, %v433_v24 }
 0x250   : > { %v432_v28 = vpop.xlane.xlu2 %431 }
 0x251   : > { %v434_v29 = vadd.f32 %v432_v28, %v412_v27 }
 0x253   : > { %437 = vst.msk [vmem:[#allocation3 + $0x8] sm:$0xff] %vm390_vm0, %v434_v29 }
 0x254 PF: > { %p669_p8 = scmp.ne.s32.totalorder %s887_s12, 1 }
 0x256   : > { %443 = sbr.rel (%p669_p8) target bundleno = 741 (0x2e5), region = 52 }
 0x25b   : > { %v446_v30 = vld [vmem:[#allocation3] sm:$0xff]  ;;  %v904_v31 = vmov 0   ;;  %v447_v32 = vld [vmem:[#allocation3 + $0x8] sm:$0xff]  ;;  %v444_v34 = vld [vmem:[#allocation2] sm:$0xff] }
 0x25c   : > { %768 = vset.pattern.permute.xlu0 %v904_v31  ;;  %769 = vlog2.f32 %v446_v30  ;;  %v445_v39 = vld [vmem:[#allocation2 + $0x8] sm:$0xff] }
 0x25d   : > { %771 = vlog2.f32 %v447_v32 }
 0x262   : > { %v770_v33 = vpop.eup %769 }
 0x263   : > { %v449_v35 = vmul.f32 0.6931472, %v770_v33  ;;  %v772_v36 = vpop.eup %771 }
 0x264   : > { %v451_v38 = vmul.f32 0.6931472, %v772_v36 }
 0x265   : > { %v452_v37 = vadd.f32 %v449_v35, %v444_v34 }
 0x266   : > { %v453_v40 = vadd.f32 %v451_v38, %v445_v39 }
 0x267   : > { %456 = vperm.xlu0 %768, %v452_v37  }
 0x26f   : > { %461 = vperm.xlu0 %768, %v453_v40  }
 0x2d9   : > { %v457_v41 = vpop.permute.xlu0 %456 }
 0x2da   : > { %v464_v42 = vsub.f32 %v983_v58, %v457_v41 }
 0x2dc   : > { %466 = vst [vmem:[#allocation9] sm:$0xff] %v464_v42 }
 0x2e1   : > { %v462_v43 = vpop.permute.xlu0 %461 }
 0x2e2   : > { %v465_v44 = vsub.f32 %v985_v62, %v462_v43 }
 0x2e4   : > { %467 = vst [vmem:[#allocation9 + $0x8] sm:$0xff] %v465_v44 }
 0x2e5 PF: > { %p719_p9 = scmp.eq.s32.totalorder %s587_s15, 1  ;;  %s485_s9 = sshll.u32 %s1023_s3, 4  ;;  %s486_s9 = int_to_ptr.hbm [resolvable:$true] %s485_s9 }
 0x2e6   : > { %s905_s10 = smov [#allocation9]   ;;  %s906_s12 = smov 128  }
 0x2e7   : > { %s483_s11 = sshll.u32 %s905_s10, 4  ;;  %s907_s18 = smov 8   ;;  %s484_s11 = int_to_ptr.vmem [resolvable:$true] %s483_s11 }
 0x2e8   : > { %701 = dma.vmem_to_hbm [thread:$0]  (%p719_p9), %s484_s11, 256, %s486_s9, [#allocation6], %s906_s12, %s906_s12, %s907_s18  }
 0x2e9 PF: > { %p720_p10 = scmp.ge.s32.totalorder %s895_s14, 2  ;;  %p721_p11 = scmp.eq.s32.totalorder %s588_s16, 1 }
 0x2eb   : > { %p712_p12 = pnand %p721_p11, %p720_p10 }
 0x2ed   : > { %p713_p13 = pneg %p712_p12 }
 0x2ef   : > { %882 = dma.done.wait (%p713_p13), [#allocation6], 256  }
 0x2f0   : > { %884 = vsyncadd (%p713_p13), [#allocation6], 4294967040  ;;  %s18_s14 = sadd.s32 1, %s895_s14   ;;  %s1026_s12 = smov %s891_s13 }
 0x2f1   : > { %p15_p0 = scmp.ge.s32.totalorder %s18_s14, 4   ;;  %s1027_s13 = smov %s1029_s17 }
 0x2f3   :  { %17 = sbr.rel (!%p15_p0) target bundleno = 5 (0x5), region = 90 }
 0x2f8   :  { %507 = vsyncpa [#allocation5], 1 }
 0x2f9   :  { %509 = vsyncpa [#allocation5 + $0x1], 1 }
 0x2fa   :  { %510 = vsyncpa [#allocation8], 1 }
 0x2fb   :  { %511 = vsyncpa [#allocation6], 1 }
 0x2fc   :  { %513 = vsyncpa [#allocation6 + $0x1], 1 }

</bundles_post_ra>
